<compile_context>
chip_gen: v7x
topology: tpu7x:2x2x1
jax: 0.10.0
libtpu: 0.0.40
codegen_flags: <defaults>
</compile_context>

<pallas_src>
import jax
import jax.numpy as jnp
import numpy as np
from jax.experimental import pallas as pl
from jax.experimental.pallas import tpu as pltpu


def _graph_attention_kernel(s_ref,        # VMEM [TB, 2H]
                            gf_ref,       # VMEM [TB, N, 2H]
                            nodes_ref,    # VMEM [TB, 1] int32
                            w_hid_ref,    # VMEM [2H, 2H]  (attn.weight[:, :2H].T)
                            w_gf_ref,     # VMEM [2H, 2H]  (attn.weight[:, 2H:].T)
                            b_ref,        # VMEM [1, 2H]   (attn.bias)
                            wv_ref,       # VMEM [1, 2H]   (v.weight row)
                            gh_ref,       # VMEM out [TB, 2H]
                            attn_ref):    # VMEM out [TB, N]  (lane-dense)
    TB, N, D2 = gf_ref.shape

    gf = gf_ref[...]                                      # [TB, N, 2H]
    gf2 = gf.reshape(TB * N, D2)                          # one big MXU operand

    # cat([hidden, graph_feats]) @ W_attn.T
    #   == hidden @ W_attn[:, :2H].T + graph_feats @ W_attn[:, 2H:].T
    proj_g = jnp.dot(gf2, w_gf_ref[...],
                     preferred_element_type=jnp.float32)  # [TB*N, 2H]
    proj_h = jnp.dot(s_ref[...], w_hid_ref[...],
                     preferred_element_type=jnp.float32)  # [TB, 2H]
    proj_h = proj_h + b_ref[...]                          # fold bias (N-independent)

    energy = jnp.tanh(proj_g.reshape(TB, N, D2) + proj_h[:, None, :])  # [TB,N,2H]

    # v(energy): VPU multiply + lane reduction instead of a [*,2H]@[2H,1]
    # MXU matmul with a 1-wide output.
    e = jnp.sum(energy * wv_ref[...][None, :, :], axis=-1)        # [TB, N]

    # Masked softmax over nodes (lane axis) with a single fused normalization.
    node_idx = jax.lax.broadcasted_iota(jnp.int32, (TB, N), 1)
    valid = node_idx < nodes_ref[...]                             # [TB, N]
    e = jnp.where(valid, e, jnp.float32(-1e30))
    m = jnp.max(e, axis=-1, keepdims=True)                        # [TB, 1]
    p = jnp.where(valid, jnp.exp(e - m), 0.0)                     # [TB, N]
    denom = jnp.sum(p, axis=-1, keepdims=True)                    # [TB, 1]
    # approx=True (EUP vrcp) is nearly free; exact keeps 1e-5 parity with ref.
    attn = p * pl.reciprocal(denom, approx=False)                 # [TB, N]
    attn_ref[...] = attn

    # Attention-weighted pooling over nodes on the MXU (batched matmul).
    gh = jnp.einsum('bqn,bnd->bqd', attn[:, None, :], gf,
                    preferred_element_type=jnp.float32)           # [TB, 1, 2H]
    gh_ref[...] = gh[:, 0, :]


def _pick_batch_tile(B, N_pad, D2):
    """Batch tile: target a few hundred MXU rows per step, capped by a VMEM
    budget for the double-buffered graph_feats block."""
    tb = max(1, 512 // N_pad)
    vmem_budget = 8 << 20                               # bytes
    tb = min(tb, max(1, vmem_budget // (2 * N_pad * D2 * 4)))
    if B <= tb:
        return B                                        # single block == full dims
    return max(8, (tb // 8) * 8)                        # keep sublane tiling clean


def graph_attention_pallas(s_t, graph_feats, nodes_batch, W_attn, b_attn, W_v):
    """s_t [B,2H], graph_feats [B,N,2H], nodes_batch [B] int,
    W_attn [2H,4H], b_attn [2H], W_v [1,2H] (PyTorch Linear conventions)."""
    B, N, D2 = graph_feats.shape

    s_t = s_t.astype(jnp.float32)
    graph_feats = graph_feats.astype(jnp.float32)
    nodes = nodes_batch.astype(jnp.int32)

    # Pad the node axis to a sublane multiple so the in-kernel
    # [TB, N, 2H] <-> [TB*N, 2H] reshapes stay layout-preserving.
    N_pad = ((N + 7) // 8) * 8
    if N_pad != N:
        graph_feats = jnp.pad(graph_feats, ((0, 0), (0, N_pad - N), (0, 0)))

    TB = _pick_batch_tile(B, N_pad, D2)
    B_pad = ((B + TB - 1) // TB) * TB
    if B_pad != B:
        s_t = jnp.pad(s_t, ((0, B_pad - B), (0, 0)))
        graph_feats = jnp.pad(graph_feats, ((0, B_pad - B), (0, 0), (0, 0)))
        nodes = jnp.pad(nodes, (0, B_pad - B), constant_values=1)

    nodes2 = nodes.reshape(B_pad, 1)
    w_hid = W_attn[:, :D2].T.astype(jnp.float32)     # [2H, 2H]
    w_gf = W_attn[:, D2:].T.astype(jnp.float32)      # [2H, 2H]
    bias = b_attn.reshape(1, D2).astype(jnp.float32)
    wv = W_v.reshape(1, D2).astype(jnp.float32)
    # (bf16 graph_feats/weights with f32 MXU accumulation would halve HBM
    #  traffic if accuracy tolerance permits; kept f32 here for exact parity.)

    grid = (B_pad // TB,)
    gh, attn = pl.pallas_call(
        _graph_attention_kernel,
        grid=grid,
        in_specs=[
            pl.BlockSpec((TB, D2), lambda i: (i, 0)),            # s_t
            pl.BlockSpec((TB, N_pad, D2), lambda i: (i, 0, 0)),  # graph_feats
            pl.BlockSpec((TB, 1), lambda i: (i, 0)),             # node counts
            pl.BlockSpec((D2, D2), lambda i: (0, 0)),            # W_hid^T
            pl.BlockSpec((D2, D2), lambda i: (0, 0)),            # W_gf^T
            pl.BlockSpec((1, D2), lambda i: (0, 0)),             # bias
            pl.BlockSpec((1, D2), lambda i: (0, 0)),             # v row
        ],
        out_specs=[
            pl.BlockSpec((TB, D2), lambda i: (i, 0)),            # graph_hidden
            pl.BlockSpec((TB, N_pad), lambda i: (i, 0)),         # attn (lane-dense)
        ],
        out_shape=(
            jax.ShapeDtypeStruct((B_pad, D2), jnp.float32),
            jax.ShapeDtypeStruct((B_pad, N_pad), jnp.float32),
        ),
        compiler_params=pltpu.CompilerParams(
            dimension_semantics=("parallel",),       # batches are independent
            vmem_limit_bytes=32 * 1024 * 1024),
    )(s_t, graph_feats, nodes2, w_hid, w_gf, bias, wv)

    return gh[:B], attn[:B, :N]


def graph_attention_ref(s_t, graph_feats, nodes_batch, W_attn, b_attn, W_v):
    """Pure-JAX reference mirroring the PyTorch module."""
    B, N, D2 = graph_feats.shape
    hidden = jnp.broadcast_to(s_t[:, None, :], (B, N, D2))
    cat = jnp.concatenate([hidden, graph_feats], axis=2)         # [B,N,4H]
    energy = jnp.tanh(cat @ W_attn.T + b_attn)                   # [B,N,2H]
    e = (energy @ W_v.T)[..., 0]                                 # [B,N]
    soft = jax.nn.softmax(e, axis=1)
    mask = (jnp.arange(N)[None, :] < nodes_batch[:, None]).astype(jnp.float32)
    masked = soft * mask
    attn = masked / masked.sum(axis=1, keepdims=True)
    gh = jnp.einsum("bn,bnd->bd", attn, graph_feats)
    return gh, attn


if __name__ == "__main__":
    H = 16           # hidden_size  -> 2H = 32, 4H = 64
    B = 2            # batch
    N = 8            # number of graph nodes
    D2, D4 = 2 * H, 4 * H

    key = jax.random.PRNGKey(0)
    k1, k2, k3, k4, k5 = jax.random.split(key, 5)

    # Deterministic parameter init (PyTorch Linear-style uniform bounds).
    bound_attn = 1.0 / np.sqrt(D4)
    bound_v = 1.0 / np.sqrt(D2)
    W_attn = jax.random.uniform(k1, (D2, D4), jnp.float32, -bound_attn, bound_attn)
    b_attn = jax.random.uniform(k2, (D2,), jnp.float32, -bound_attn, bound_attn)
    W_v = jax.random.uniform(k3, (1, D2), jnp.float32, -bound_v, bound_v)

    # Inputs.
    s_t = jax.random.normal(k4, (B, D2), jnp.float32)
    graph_feats = jax.random.normal(k5, (B, N, D2), jnp.float32)
    nodes_batch = jnp.array([5, 8], dtype=jnp.int32)   # valid node counts per batch

    gh, attn = graph_attention_pallas(s_t, graph_feats, nodes_batch,
                                      W_attn, b_attn, W_v)
    jax.block_until_ready((gh, attn))

    gh_ref, attn_ref = graph_attention_ref(s_t, graph_feats, nodes_batch,
                                           W_attn, b_attn, W_v)

    assert gh.shape == (B, D2) and attn.shape == (B, N)
    np.testing.assert_allclose(np.asarray(gh), np.asarray(gh_ref), atol=1e-5, rtol=1e-5)
    np.testing.assert_allclose(np.asarray(attn), np.asarray(attn_ref), atol=1e-5, rtol=1e-5)

    print("KERNEL_OK")
</pallas_src>

<mosaic_0001>
module attributes {stable_mosaic.version = 11 : i64} {
  func.func @_graph_attention_kernel(%arg0: i32, %arg1: memref<2x32xf32, #tpu.memory_space<vmem>>, %arg2: memref<2x8x32xf32, #tpu.memory_space<vmem>>, %arg3: memref<2x1xi32, #tpu.memory_space<vmem>>, %arg4: memref<32x32xf32, #tpu.memory_space<vmem>>, %arg5: memref<32x32xf32, #tpu.memory_space<vmem>>, %arg6: memref<1x32xf32, #tpu.memory_space<vmem>>, %arg7: memref<1x32xf32, #tpu.memory_space<vmem>>, %arg8: memref<2x32xf32, #tpu.memory_space<vmem>>, %arg9: memref<2x8xf32, #tpu.memory_space<vmem>>) attributes {dimension_semantics = [#tpu.dimension_semantics<parallel>], iteration_bounds = array<i64: 1>, scalar_prefetch = 0 : i64, scratch_operands = 0 : i64, tpu.core_type = #tpu.core_type<tc>, window_params = [{transform_indices = @transform_0, window_bounds = array<i64: 2, 32>}, {transform_indices = @transform_1, window_bounds = array<i64: 2, 8, 32>}, {transform_indices = @transform_2, window_bounds = array<i64: 2, 1>}, {pipeline_mode = #tpu.pipeline_mode<synchronous>, transform_indices = @transform_3, window_bounds = array<i64: 32, 32>}, {pipeline_mode = #tpu.pipeline_mode<synchronous>, transform_indices = @transform_4, window_bounds = array<i64: 32, 32>}, {pipeline_mode = #tpu.pipeline_mode<synchronous>, transform_indices = @transform_5, window_bounds = array<i64: 1, 32>}, {pipeline_mode = #tpu.pipeline_mode<synchronous>, transform_indices = @transform_6, window_bounds = array<i64: 1, 32>}, {transform_indices = @transform_7, window_bounds = array<i64: 2, 32>}, {transform_indices = @transform_8, window_bounds = array<i64: 2, 8>}]} {
    %c0 = arith.constant 0 : index
    %c0_0 = arith.constant 0 : index
    %c0_1 = arith.constant 0 : index
    %0 = vector.load %arg2[%c0, %c0_0, %c0_1] : memref<2x8x32xf32, #tpu.memory_space<vmem>>, vector<2x8x32xf32>
    %1 = vector.shape_cast %0 : vector<2x8x32xf32> to vector<16x32xf32>
    %c0_2 = arith.constant 0 : index
    %c0_3 = arith.constant 0 : index
    %2 = vector.load %arg5[%c0_2, %c0_3] : memref<32x32xf32, #tpu.memory_space<vmem>>, vector<32x32xf32>
    %cst = arith.constant dense<0.000000e+00> : vector<16x32xf32>
    %3 = tpu.matmul %1, %2, %cst {dimension_numbers = #tpu.dot_dimension_numbers<[1], [0], [0], [1], [0, 0, 1, 1], [], []>} : vector<16x32xf32>, vector<32x32xf32>, vector<16x32xf32> -> vector<16x32xf32>
    %c0_4 = arith.constant 0 : index
    %c0_5 = arith.constant 0 : index
    %4 = vector.load %arg1[%c0_4, %c0_5] : memref<2x32xf32, #tpu.memory_space<vmem>>, vector<2x32xf32>
    %c0_6 = arith.constant 0 : index
    %c0_7 = arith.constant 0 : index
    %5 = vector.load %arg4[%c0_6, %c0_7] : memref<32x32xf32, #tpu.memory_space<vmem>>, vector<32x32xf32>
    %cst_8 = arith.constant dense<0.000000e+00> : vector<2x32xf32>
    %6 = tpu.matmul %4, %5, %cst_8 {dimension_numbers = #tpu.dot_dimension_numbers<[1], [0], [0], [1], [0, 0, 1, 1], [], []>} : vector<2x32xf32>, vector<32x32xf32>, vector<2x32xf32> -> vector<2x32xf32>
    %c0_9 = arith.constant 0 : index
    %c0_10 = arith.constant 0 : index
    %7 = vector.load %arg6[%c0_9, %c0_10] : memref<1x32xf32, #tpu.memory_space<vmem>>, vector<1x32xf32>
    %8 = vector.broadcast %7 : vector<1x32xf32> to vector<2x32xf32>
    %9 = arith.addf %6, %8 : vector<2x32xf32>
    %10 = vector.shape_cast %3 : vector<16x32xf32> to vector<2x8x32xf32>
    %11 = vector.shape_cast %9 : vector<2x32xf32> to vector<2x1x32xf32>
    %12 = vector.broadcast %11 : vector<2x1x32xf32> to vector<2x8x32xf32>
    %13 = arith.addf %10, %12 : vector<2x8x32xf32>
    %14 = math.tanh %13 : vector<2x8x32xf32>
    %c0_11 = arith.constant 0 : index
    %c0_12 = arith.constant 0 : index
    %15 = vector.load %arg7[%c0_11, %c0_12] : memref<1x32xf32, #tpu.memory_space<vmem>>, vector<1x32xf32>
    %16 = vector.shape_cast %15 : vector<1x32xf32> to vector<1x1x32xf32>
    %17 = vector.broadcast %16 : vector<1x1x32xf32> to vector<2x8x32xf32>
    %18 = arith.mulf %14, %17 : vector<2x8x32xf32>
    %cst_13 = arith.constant dense<0.000000e+00> : vector<2x8xf32>
    %19 = vector.multi_reduction <add>, %18, %cst_13 [2] : vector<2x8x32xf32> to vector<2x8xf32>
    %20 = tpu.iota {dimensions = array<i32: 1>} : vector<2x8xi32>
    %c0_14 = arith.constant 0 : index
    %c0_15 = arith.constant 0 : index
    %21 = vector.load %arg3[%c0_14, %c0_15] : memref<2x1xi32, #tpu.memory_space<vmem>>, vector<2x1xi32>
    %22 = vector.broadcast %21 : vector<2x1xi32> to vector<2x8xi32>
    %23 = arith.cmpi slt, %20, %22 : vector<2x8xi32>
    %cst_16 = arith.constant -1.000000e+30 : f32
    %24 = vector.broadcast %cst_16 : f32 to vector<2x8xf32>
    %25 = arith.select %23, %19, %24 : vector<2x8xi1>, vector<2x8xf32>
    %cst_17 = arith.constant dense<0xFF800000> : vector<2xf32>
    %26 = vector.multi_reduction <maximumf>, %25, %cst_17 [1] : vector<2x8xf32> to vector<2xf32>
    %27 = vector.shape_cast %26 : vector<2xf32> to vector<2x1xf32>
    %28 = vector.broadcast %27 : vector<2x1xf32> to vector<2x8xf32>
    %29 = arith.subf %25, %28 : vector<2x8xf32>
    %30 = math.exp %29 : vector<2x8xf32>
    %cst_18 = arith.constant 0.000000e+00 : f32
    %31 = vector.broadcast %cst_18 : f32 to vector<2x8xf32>
    %32 = arith.select %23, %30, %31 : vector<2x8xi1>, vector<2x8xf32>
    %cst_19 = arith.constant dense<0.000000e+00> : vector<2xf32>
    %33 = vector.multi_reduction <add>, %32, %cst_19 [1] : vector<2x8xf32> to vector<2xf32>
    %34 = vector.shape_cast %33 : vector<2xf32> to vector<2x1xf32>
    %35 = tpu.reciprocal %34 : vector<2x1xf32> -> vector<2x1xf32>
    %36 = vector.broadcast %35 : vector<2x1xf32> to vector<2x8xf32>
    %37 = arith.mulf %32, %36 : vector<2x8xf32>
    %c0_20 = arith.constant 0 : index
    %c0_21 = arith.constant 0 : index
    %38 = vector.load %arg9[%c0_20, %c0_21] : memref<2x8xf32, #tpu.memory_space<vmem>>, vector<2x8xf32>
    tpu.vector_store %arg9[%c0_20, %c0_21], %37 {strides = array<i32>} : memref<2x8xf32, #tpu.memory_space<vmem>>, vector<2x8xf32>,
    %39 = vector.shape_cast %37 : vector<2x8xf32> to vector<2x1x8xf32>
    "tpu.trace_start"() <{level = 10 : i32, message = "bqn,bnd->bqd"}> : () -> ()
    %cst_22 = arith.constant dense<0.000000e+00> : vector<2x1x32xf32>
    %40 = tpu.matmul %39, %0, %cst_22 {dimension_numbers = #tpu.dot_dimension_numbers<[2], [1], [1], [2], [0, 0, 0, 1, 1, 2], [0], [0]>} : vector<2x1x8xf32>, vector<2x8x32xf32>, vector<2x1x32xf32> -> vector<2x1x32xf32>
    "tpu.trace_stop"() : () -> ()
    %41 = vector.shape_cast %40 : vector<2x1x32xf32> to vector<2x32xf32>
    %c0_23 = arith.constant 0 : index
    %c0_24 = arith.constant 0 : index
    %42 = vector.load %arg8[%c0_23, %c0_24] : memref<2x32xf32, #tpu.memory_space<vmem>>, vector<2x32xf32>
    tpu.vector_store %arg8[%c0_23, %c0_24], %41 {strides = array<i32>} : memref<2x32xf32, #tpu.memory_space<vmem>>, vector<2x32xf32>,
    return
  }
  func.func @transform_0(%arg0: i32) -> (i32, i32) {
    %c0_i32 = arith.constant 0 : i32
    %c0_i32_0 = arith.constant 0 : i32
    return %arg0, %c0_i32 : i32, i32
  }
  func.func @transform_1(%arg0: i32) -> (i32, i32, i32) {
    %c0_i32 = arith.constant 0 : i32
    %c0_i32_0 = arith.constant 0 : i32
    %c0_i32_1 = arith.constant 0 : i32
    return %arg0, %c0_i32, %c0_i32_0 : i32, i32, i32
  }
  func.func @transform_2(%arg0: i32) -> (i32, i32) {
    %c0_i32 = arith.constant 0 : i32
    %c0_i32_0 = arith.constant 0 : i32
    return %arg0, %c0_i32 : i32, i32
  }
  func.func @transform_3(%arg0: i32) -> (i32, i32) {
    %c0_i32 = arith.constant 0 : i32
    %c0_i32_0 = arith.constant 0 : i32
    %c0_i32_1 = arith.constant 0 : i32
    return %c0_i32, %c0_i32_0 : i32, i32
  }
  func.func @transform_4(%arg0: i32) -> (i32, i32) {
    %c0_i32 = arith.constant 0 : i32
    %c0_i32_0 = arith.constant 0 : i32
    %c0_i32_1 = arith.constant 0 : i32
    return %c0_i32, %c0_i32_0 : i32, i32
  }
  func.func @transform_5(%arg0: i32) -> (i32, i32) {
    %c0_i32 = arith.constant 0 : i32
    %c0_i32_0 = arith.constant 0 : i32
    %c0_i32_1 = arith.constant 0 : i32
    return %c0_i32, %c0_i32_0 : i32, i32
  }
  func.func @transform_6(%arg0: i32) -> (i32, i32) {
    %c0_i32 = arith.constant 0 : i32
    %c0_i32_0 = arith.constant 0 : i32
    %c0_i32_1 = arith.constant 0 : i32
    return %c0_i32, %c0_i32_0 : i32, i32
  }
  func.func @transform_7(%arg0: i32) -> (i32, i32) {
    %c0_i32 = arith.constant 0 : i32
    %c0_i32_0 = arith.constant 0 : i32
    return %arg0, %c0_i32 : i32, i32
  }
  func.func @transform_8(%arg0: i32) -> (i32, i32) {
    %c0_i32 = arith.constant 0 : i32
    %c0_i32_0 = arith.constant 0 : i32
    return %arg0, %c0_i32 : i32, i32
  }
}

</mosaic_0001>

<bundles_post_ra>
// kernel: tpu_custom_call.1
= control target key start
LH: loop header
LB: loop body
LE: loop exit
PB: predicated region body
PF: predicated region fallthrough
CT: control target
= control target key end

     0   :  { %14 = vsyncpa [#allocation3], 0  ;;  %s902_s0 = inlined_call_operand.vmem [shape: f32[2,32], index: 0, kind: input, shape index: {}]   ;;  %s903_s1 = inlined_call_operand.hbm [shape: f32[2,8,32], index: 1, kind: input, shape index: {}]   ;;  %s904_s2 = inlined_call_operand.vmem [shape: s32[2,1], index: 2, kind: input, shape index: {}]   ;;  %s905_s3 = inlined_call_operand.hbm [shape: f32[32,32], index: 3, kind: input, shape index: {}]   ;;  %s906_s4 = inlined_call_operand.hbm [shape: f32[32,32], index: 4, kind: input, shape index: {}]   ;;  %s907_s5 = inlined_call_operand.vmem [shape: f32[1,32], index: 5, kind: input, shape index: {}]   ;;  %s908_s6 = inlined_call_operand.vmem [shape: f32[1,32], index: 6, kind: input, shape index: {}]   ;;  %s909_s7 = inlined_call_operand.hbm [shape: f32[2,32], index: 7, kind: output, shape index: {0}]   ;;  %s910_s8 = inlined_call_operand.hbm [shape: f32[2,8], index: 8, kind: output, shape index: {1}]  }
   0x1   :  { %15 = vsyncpa [#allocation6], 0 }
   0x2   :  { %16 = vsyncpa [#allocation4], 0 }
   0x3   :  { %17 = vsyncpa [#allocation10], 0  ;;  %s744_s27 = smov [#allocation5]   ;;  %s745_s29 = smov [#allocation2]  }
   0x4   :  { %s39_s28 = sshll.u32 %s744_s27, 4  ;;  %s25_s30 = sshll.u32 %s745_s29, 4  ;;  %s40_s28 = int_to_ptr.vmem [resolvable:$true] %s39_s28  ;;  %s801_s30 = int_to_ptr.vmem [resolvable:$true] %s25_s30 }
   0x5   :  { %s626_s11 = scalar_lea.hbm %s905_s3, 512 }
   0x6   :  { %p627_p0 = scmp.ne.s32.totalorder %s905_s3, %s626_s11  ;;  %p630_p1 = scmp.lt.u32.totalorder %s626_s11, %s905_s3 }
   0x8   :  { %p632_p2 = pnand %p630_p1, %p627_p0 }
   0xa   :  { %635 = shalt.err (!%p632_p2)
}
   0xb   :  { %s636_s16 = scalar_lea.vmem %s40_s28, 512  ;;  %p641_p4 = scmp.lt.s32.totalorder %s40_s28, %s40_s28 }
   0xc   :  { %p637_p3 = scmp.ne.s32.totalorder %s40_s28, %s636_s16  ;;  %p642_p5 = scmp.lt.s32.totalorder %s636_s16, %s636_s16 }
   0xe   :  { %p643_p6 = por %p642_p5, %p641_p4 }
  0x10   :  { %p644_p7 = pnand %p643_p6, %p637_p3 }
  0x12   :  { %647 = shalt.err (!%p644_p7)
}
  0x13   :  { %s746_s17 = smov 128   ;;  %s747_s18 = smov 8  }
  0x14   :  { %45 = dma.hbm_to_vmem [thread:$0]  %s905_s3, 512, %s40_s28, [#allocation6], %s746_s17, %s746_s17, %s747_s18  }
  0x15   :  { %s648_s23 = scalar_lea.hbm %s903_s1, 256 }
  0x16   :  { %p649_p8 = scmp.ne.s32.totalorder %s903_s1, %s648_s23  ;;  %p652_p9 = scmp.lt.u32.totalorder %s648_s23, %s903_s1 }
  0x18   :  { %p654_p10 = pnand %p652_p9, %p649_p8 }
  0x1a   :  { %657 = shalt.err (!%p654_p10)
}
  0x1b   :  { %s658_s29 = scalar_lea.vmem %s801_s30, 256  ;;  %p663_p12 = scmp.lt.s32.totalorder %s801_s30, %s801_s30 }
  0x1c   :  { %p659_p11 = scmp.ne.s32.totalorder %s801_s30, %s658_s29  ;;  %p664_p13 = scmp.lt.s32.totalorder %s658_s29, %s658_s29 }
  0x1e   :  { %p665_p0 = por %p664_p13, %p663_p12 }
  0x20   :  { %p666_p1 = pnand %p665_p0, %p659_p11 }
  0x22   :  { %669 = shalt.err (!%p666_p1)
}
  0x23   :  { %31 = dma.hbm_to_vmem [thread:$0]  %s903_s1, 256, %s801_s30, [#allocation3], %s746_s17, %s746_s17, %s747_s18  }
  0x24   :  { %s748_s9 = smov [#allocation7]   ;;  %s670_s13 = scalar_lea.hbm %s906_s4, 512 }
  0x25   :  { %s51_s10 = sshll.u32 %s748_s9, 4  ;;  %p671_p2 = scmp.ne.s32.totalorder %s906_s4, %s670_s13  ;;  %s52_s10 = int_to_ptr.vmem [resolvable:$true] %s51_s10 }
  0x26   :  { %p674_p3 = scmp.lt.u32.totalorder %s670_s13, %s906_s4 }
  0x28   :  { %p676_p4 = pnand %p674_p3, %p671_p2 }
  0x2a   :  { %679 = shalt.err (!%p676_p4)
}
  0x2b   :  { %s680_s20 = scalar_lea.vmem %s52_s10, 512  ;;  %p685_p6 = scmp.lt.s32.totalorder %s52_s10, %s52_s10 }
  0x2c   :  { %p681_p5 = scmp.ne.s32.totalorder %s52_s10, %s680_s20  ;;  %p686_p7 = scmp.lt.s32.totalorder %s680_s20, %s680_s20 }
  0x2e   :  { %p687_p8 = por %p686_p7, %p685_p6 }
  0x30   :  { %p688_p9 = pnand %p687_p8, %p681_p5 }
  0x32   :  { %691 = shalt.err (!%p688_p9)
}
  0x33   :  { %57 = dma.hbm_to_vmem [thread:$0]  %s906_s4, 512, %s52_s10, [#allocation6], %s746_s17, %s746_s17, %s747_s18  }
  0x34   :  { %736 = dma.done.wait [#allocation3], 256  }
  0x35   :  { %737 = vsyncadd [#allocation3], 4294967040 }
  0x36   :  { %738 = dma.done.wait [#allocation6], 1024  }
  0x37   :  { %739 = vsyncadd [#allocation6], 4294966272  ;;  %v749_v0 = vmov 0.0|0.0   ;;  %vm750_vm0 = vmmov 0   ;;  %v751_v1 = vmov 0.0   ;;  %v160_v2 = vld [vmem:[#allocation5] sm:$0xff]  ;;  %v248_v17 = vlaneseq }
  0x38   :  { %598 = vmatprep.subr.bf16.mxu1 %v749_v0  ;;  %577 = vmatprep.mubr.msk.f32.mxu1 %vm750_vm0, %v751_v1  ;;  %v161_v3 = vld [vmem:[#allocation5 + $0x8] sm:$0xff]  ;;  %v162_v4 = vld [vmem:[#allocation5 + $0x10] sm:$0xff]  ;;  %v163_v6 = vld [vmem:[#allocation5 + $0x18] sm:$0xff]  ;;  %vm77_vm1 = vcmask 261120   ;;  %v752_v21 = vmov 0   ;;  %vm313_vm2 = vcmask 1041409  }
  0x39   :  { %v599_v5 = vpack.c.bf16 %v161_v3, %v160_v2  ;;  %v73_v7 = vld [vmem:[#allocation7] sm:$0xff]  ;;  %v74_v8 = vld [vmem:[#allocation7 + $0x8] sm:$0xff]  ;;  %v75_v10 = vld [vmem:[#allocation7 + $0x10] sm:$0xff]  ;;  %v602_v12 = vpack.c.bf16 %v163_v6, %v162_v4  ;;  %v249_v18 = vshrl.u32 %v248_v17, 7  ;;  %v297_v20 = vand.u32 127, %v248_v17  ;;  %616 = vset.pattern.permute.xlu1 %v752_v21  ;;  %617 = vset.pattern.permute.xlu0 %v752_v21 }
  0x3a   :  { %v590_v9 = vpack.c.bf16 %v74_v8, %v73_v7  ;;  %v76_v11 = vld [vmem:[#allocation7 + $0x18] sm:$0xff]  ;;  %v71_v14 = vld [vmem:[#allocation2] sm:$0xff]  ;;  %v753_v23 = vmov 1966171168   ;;  %vm317_vm4 = vcmask 58368   ;;  %vm354_vm5 = vcmask 64512  }
  0x3b   :  { %600 = vmatpush3.bf16.msra.mxu1 %v599_v5  ;;  %v594_v13 = vpack.c.bf16 %v76_v11, %v75_v10  ;;  %566 = vmatprep.mubr.msk.f32.mxu0 %vm77_vm1, %v71_v14  ;;  %v159_v15 = vld [vmem:[%s902_s0] sm:$0x3]  ;;  %v72_v16 = vld [vmem:[#allocation2 + $0x8] sm:$0xff]  ;;  %v307_v22 = vsub.s32 %v297_v20, %v249_v18  ;;  %v246_v24 = vunpack.c.l.s4 %v753_v23  ;;  %v269_v33 = vsub.s32 0, %v249_v18 }
  0x3c   :  { %601 = vmatprep.subr.bf16.mxu1 %v749_v0  ;;  %591 = vmatprep.subr.bf16.mxu0 %v590_v9  ;;  %v298_v19 = vld [vmem:[%s904_s2] sm:$0x3] }
  0x3d   :  { %593 = vmatpush3.bf16.msra.mxu0 %v590_v9  ;;  %300 = vperm.xlu1 %616, %v298_v19   ;;  %v247_v25 = vunpack.c.0.s8 %v246_v24  ;;  %v538_v26 = vld [vmem:[%s907_s5] ss:$0 sm:$0xff]  ;;  %s754_s5 = smov [#allocation9]  }
  0x3e   :  { %595 = vmatprep.subr.bf16.mxu0 %v594_v13  ;;  %v540_v42 = vld [vmem:[%s908_s6] ss:$0 sm:$0xff]  ;;  %s522_s6 = sshll.u32 %s754_s5, 4  ;;  %s523_s6 = int_to_ptr.vmem [resolvable:$true] %s522_s6 }
  0x3f   :  { %603 = vmatpush3.bf16.msra.mxu1 %v602_v12  ;;  %v250_v27 = vsub.s32 %v247_v25, %v249_v18  ;;  %s692_s24 = scalar_lea.vmem %s523_s6, 32  ;;  %p697_p11 = scmp.lt.s32.totalorder %s523_s6, %s523_s6 }
  0x40   :  { %585 = vmatprep.subr.mxu1 %v751_v1  ;;  %p693_p10 = scmp.ne.s32.totalorder %s523_s6, %s692_s24  ;;  %p698_p12 = scmp.lt.s32.totalorder %s692_s24, %s692_s24 }
  0x41   :  { %597 = vmatpush3.bf16.msra.mxu0 %v594_v13 }
  0x42   :  { %578 = vmatmul.mubr.msk.f32.vlgmr.msra.gmra.mrb[0].mxu1 %vm77_vm1, %v159_v15  ;;  %580 = vmatprep.subr.mxu0 %v751_v1  ;;  %p699_p13 = por %p698_p12, %p697_p11 }
  0x43   :  { %586 = vmatpush3.msra.mxu1 %v72_v16  ;;  %587 = vmatprep.mubr.msk.f32.mxu1 %vm750_vm0, %v751_v1 }
  0x44   :  { %567 = vmatmul.mubr.msk.f32.vlgmr.msra.gmra.mrb[0].mxu0 %vm77_vm1, %v72_v16  ;;  %p700_p0 = pnand %p699_p13, %p693_p10 }
  0x45   :  { %581 = vmatpush3.msra.mxu0 %v71_v14  ;;  %582 = vmatprep.mubr.msk.f32.mxu0 %vm750_vm0, %v751_v1 }
  0xbc   :  { %v301_v50 = vpop.permute.xlu1 %300 }
  0xbd   :  { %vm302_vm3 = vcmp.lt.s32.totalorder %v297_v20, %v301_v50 }
 0x115   :  { %v240_v28 = vpop.f32.mrb[0].mxu1 }
 0x116   :  { %v241_v29 = vadd.f32 %v538_v26, %v240_v28  ;;  %v579_v30 = vpop.f32.mrb[1].mxu1 }
 0x117   :  { %v568_v31 = vpop.f32.mrb[0].mxu0 }
 0x118   :  { %v251_v32 = vrot.slane %v241_v29, %v250_v27  ;;  %v150_v34 = vpop.f32.mrb[1].mxu0 }
 0x11a   :  { %v252_v35 = vcombine.high %v251_v32, %v251_v32  ;;  %v259_v36 = vrot.slane %v251_v32, %v250_v27 }
 0x11c   :  { %v266_v37 = vrot.slane %v252_v35, %v250_v27  ;;  %v270_v38 = vrot.slane %v259_v36, %v269_v33 }
 0x11e   :  { %v274_v39 = vrot.slane %v266_v37, %v269_v33  ;;  %v277_v40 = vadd.f32 %v270_v38, %v150_v34 }
 0x120   :  { %v278_v41 = vadd.f32 %v568_v31, %v274_v39  ;;  %618 = vtanh.f32 %v277_v40 }
 0x122   :  { %620 = vtanh.f32 %v278_v41 }
 0x12a   :  { %v619_v43 = vpop.eup %618 }
 0x12b   :  { %v288_v44 = vmul.f32 %v619_v43, %v540_v42 }
 0x12c   :  { %v621_v45 = vpop.eup %620 }
 0x12d   :  { %v290_v46 = vsel %vm77_vm1, %v288_v44, 0.0  ;;  %v289_v47 = vmul.f32 %v621_v45, %v540_v42 }
 0x12e   :  { %291 = vadd.xlane.f32.xlu0 %v290_v46 }
 0x12f   :  { %v293_v48 = vsel %vm77_vm1, %v289_v47, 0.0 }
 0x132   :  { %294 = vadd.xlane.f32.xlu0 %v293_v48 }
 0x1bb   :  { %v292_v49 = vpop.xlane.xlu0 %291 }
 0x1bc   :  { %v308_v52 = vrot.slane %v292_v49, %v307_v22 }
 0x1bf   :  { %v295_v51 = vpop.xlane.xlu0 %294 }
 0x1c0   :  { %v312_v53 = vrot.slane %v295_v51, %v307_v22 }
 0x1c2   :  { %v314_v54 = vsel %vm313_vm2, %v312_v53, %v308_v52 }
 0x1c3   :  { %v316_v55 = vsel %vm302_vm3, %v314_v54, -1e+30 }
 0x1c4   :  { %v318_v56 = vsel %vm317_vm4, %v316_v55, -inf }
 0x1c5   :  { %319 = vmax.xlane.f32.xlu1 %v318_v56 }
 0x252   :  { %v320_v57 = vpop.xlane.xlu1 %319 }
 0x253   :  { %v321_v58 = vsub.f32 %v316_v55, %v320_v57 }
 0x255   :  { %v322_v59 = vmul.f32 1.442695, %v321_v58 }
 0x257   :  { %622 = vpow2.f32 %v322_v59 }
 0x261   :  { %v623_v60 = vpop.eup %622 }
 0x262   :  { %v324_v61 = vsel %vm302_vm3, %v623_v60, 0.0 }
 0x263   :  { %v325_v62 = vsel %vm317_vm4, %v324_v61, 0.0 }
 0x264   :  { %326 = vadd.xlane.f32.xlu0 %v325_v62 }
 0x2f1   :  { %v327_v63 = vpop.xlane.xlu0 %326 }
 0x2f2   :  { %624 = vrcp.f32 %v327_v63 }
 0x2fc   :  { %v625_v0 = vpop.eup %624 }
 0x2fd   :  { %v329_v1 = vmul.f32 %v625_v0, %v324_v61 }
 0x2ff   :  { %v338_v2 = vrot.slane %v329_v1, %v250_v27  ;;  %330 = vst.msk [vmem:[#allocation9] sm:$0x3] %vm317_vm4, %v329_v1 }
 0x301   :  { %v346_v3 = vrot.slane %v338_v2, %v250_v27  ;;  %v339_v4 = vcombine.high %v338_v2, %v338_v2 }
 0x303   :  { %583 = vmatmul.mubr.msk.f32.vlgmr.msra.gmra.mrb[2].mxu0 %vm354_vm5, %v346_v3  ;;  %v353_v5 = vrot.slane %v339_v4, %v250_v27 }
 0x305   :  { %588 = vmatmul.mubr.msk.f32.vlgmr.msra.gmra.mrb[2].mxu1 %vm354_vm5, %v353_v5 }
 0x306   :  { %703 = shalt.err (!%p700_p0)
}
 0x307   :  { %s704_s27 = scalar_lea.hbm %s910_s8, 32 }
 0x308   :  { %p705_p1 = scmp.ne.s32.totalorder %s910_s8, %s704_s27  ;;  %p708_p2 = scmp.lt.u32.totalorder %s704_s27, %s910_s8 }
 0x30a   :  { %p710_p3 = pnand %p708_p2, %p705_p1 }
 0x30c   :  { %713 = shalt.err (!%p710_p3)
}
 0x30d   :  { %525 = dma.vmem_to_hbm [thread:$0]  %s523_s6, 32, %s910_s8, [#allocation10]   ;;  %vm504_vm6 = vcmask 254976  }
 0x30e   :  { %s755_s12 = smov [#allocation8]  }
 0x30f   :  { %s512_s13 = sshll.u32 %s755_s12, 4  ;;  %s513_s13 = int_to_ptr.vmem [resolvable:$true] %s512_s13 }
 0x310   :  { %s714_s14 = scalar_lea.vmem %s513_s13, 32  ;;  %p719_p5 = scmp.lt.s32.totalorder %s513_s13, %s513_s13 }
 0x311   :  { %p715_p4 = scmp.ne.s32.totalorder %s513_s13, %s714_s14  ;;  %p720_p6 = scmp.lt.s32.totalorder %s714_s14, %s714_s14 }
 0x313   :  { %p721_p7 = por %p720_p6, %p719_p5 }
 0x315   :  { %p722_p8 = pnand %p721_p7, %p715_p4 }
 0x3d6   :  { %v423_v6 = vpop.f32.mrb[2].mxu0 }
 0x3d7   :  { %v584_v7 = vpop.f32.mrb[3].mxu0 }
 0x3d8   :  { %v495_v8 = vpop.f32.mrb[2].mxu1 }
 0x3d9   :  { %v501_v9 = vrot.slane %v495_v8, 7  ;;  %v589_v10 = vpop.f32.mrb[3].mxu1 }
 0x3db   :  { %v502_v11 = vsel %vm313_vm2, %v501_v9, %v423_v6 }
 0x3dc   :  { %505 = vst.msk [vmem:[#allocation8] sm:$0x3] %vm504_vm6, %v502_v11 }
 0x3dd   :  { %725 = shalt.err (!%p722_p8)
}
 0x3de   :  { %s726_s16 = scalar_lea.hbm %s909_s7, 32 }
 0x3df   :  { %p727_p9 = scmp.ne.s32.totalorder %s909_s7, %s726_s16  ;;  %p730_p10 = scmp.lt.u32.totalorder %s726_s16, %s909_s7 }
 0x3e1   :  { %p732_p11 = pnand %p730_p10, %p727_p9 }
 0x3e3   :  { %735 = shalt.err (!%p732_p11)
}
 0x3e4   :  { %515 = dma.vmem_to_hbm [thread:$0]  %s513_s13, 32, %s909_s7, [#allocation4]  }
 0x3e5   :  { %740 = dma.done.wait [#allocation4], 32  }
 0x3e6   :  { %741 = vsyncadd [#allocation4], 4294967264 }
 0x3e7   :  { %742 = dma.done.wait [#allocation10], 32  }
 0x3e8   :  { %743 = vsyncadd [#allocation10], 4294967264 }
 0x3e9   :  { %532 = vsyncpa [#allocation3], 1 }
 0x3ea   :  { %533 = vsyncpa [#allocation6], 1 }
 0x3eb   :  { %534 = vsyncpa [#allocation4], 1 }
 0x3ec   :  { %535 = vsyncpa [#allocation10], 1 }

</bundles_post_ra>
